<compile_context>
chip_gen: v5e
topology: v5e:2x2
jax: 0.10.0
libtpu: 0.0.40
codegen_flags: <defaults>
</compile_context>

<pallas_src>
import math

import jax
import jax.numpy as jnp
from jax.experimental import pallas as pl
from jax.experimental.pallas import tpu as pltpu


def _round_up(n, m):
    return ((n + m - 1) // m) * m


# --------------------------------------------------------------------------- #
# Kernel
# --------------------------------------------------------------------------- #
def _fused_attention_kernel(x_ref, wqkv_ref, bqkv_ref, rseq_ref, cid_ref, o_ref):
    """One grid step over a (rows = Bt*Lp, D) tile of flattened sequences."""
    in_dt = x_ref.dtype
    Dp = o_ref.shape[-1]

    x2 = x_ref[...]                                            # (rows, D)

    # Fused QKV projection: one MXU push, f32 accumulation, f32 bias add.
    qkv = jnp.dot(x2, wqkv_ref[...], preferred_element_type=jnp.float32)
    qkv = qkv + bqkv_ref[...]                                  # (rows, 3*Dp)

    # Full-Dp, lane-aligned column blocks (padded cols are exact zeros).
    q = qkv[:, 0:Dp].astype(in_dt)
    k = qkv[:, Dp:2 * Dp].astype(in_dt)
    v = qkv[:, 2 * Dp:3 * Dp].astype(in_dt)

    # One well-shaped score matmul over the whole row tile (1/sqrt(D) already
    # folded into the Q columns of the fused weight / bias).
    s = jnp.einsum("ld,md->lm", q, k, preferred_element_type=jnp.float32)

    # Block-diagonal + padded-key mask via broadcast compare of tiny int32
    # id vectors (rows,1) vs (1,rows); padded key columns carry id = -1.
    valid = rseq_ref[...] == cid_ref[...]                      # (rows, rows)
    s = jnp.where(valid, s, -1e30)

    s = s - jnp.max(s, axis=-1, keepdims=True)
    p = jnp.exp(s)
    p = p * pl.reciprocal(jnp.sum(p, axis=-1, keepdims=True), approx=True)

    out = jnp.dot(p.astype(in_dt), v, preferred_element_type=jnp.float32)
    o_ref[...] = out.astype(o_ref.dtype)                       # lane-dense store


# --------------------------------------------------------------------------- #
# Wrapper helpers
# --------------------------------------------------------------------------- #
def _tpu_hw_params():
    """(vmem_capacity_bytes, likely_multi_tensorcore).  Conservative defaults."""
    vmem_cap = 128 * 1024 * 1024
    try:
        vmem_cap = int(pltpu.get_tpu_info().vmem_capacity_bytes)
    except Exception:
        pass
    # v7x: 64 MiB VMEM per TC, 2 TCs/chip.  v5e/v6e: 128 MiB, 1 TC.
    multi_tc = vmem_cap <= 64 * 1024 * 1024
    return vmem_cap, multi_tc


def _pick_block_b(B, Lp, *, target_rows, keep_two_steps):
    """Batch elements per grid step (must divide B; rows = bt*Lp is 8-aligned)."""
    bt = max(1, min(B, max(1, target_rows // max(Lp, 1))))
    if keep_two_steps and B >= 2:
        bt = min(bt, max(1, B // 2))     # leave >=2 steps for 2-TC grid sharding
    while bt > 1 and B % bt:
        bt -= 1
    return bt


def _estimate_vmem_bytes(rows, D, Dp, x_itemsize, w_itemsize):
    return int(
        2 * rows * D * x_itemsize          # double-buffered x tiles
        + 2 * rows * Dp * x_itemsize       # double-buffered out tiles
        + 2 * D * 3 * Dp * w_itemsize      # fused weight buffers
        + 2 * 3 * Dp * 4                   # fused bias buffers
        + rows * 3 * Dp * 4                # f32 qkv intermediate
        + 3 * rows * Dp * x_itemsize       # q/k/v casts
        + 3 * rows * rows * 4              # score / prob / mask tiles
        + rows * Dp * 4                    # f32 PV accumulator
    )


def prepare_qkv(wq, bq, wk, bk, wv, bv):
    """Fuse + pre-transpose the three nn.Linear weights ONCE (layer init)."""
    D = wq.shape[0]
    Dp = _round_up(D, 128)                 # lane-aligned stride per projection
    scale = 1.0 / math.sqrt(D)
    w_dt = wq.dtype

    wqkv = jnp.zeros((D, 3 * Dp), dtype=w_dt)
    wqkv = wqkv.at[:, 0:D].set((wq * scale).T.astype(w_dt))   # scale folded in Q
    wqkv = wqkv.at[:, Dp:Dp + D].set(wk.T.astype(w_dt))
    wqkv = wqkv.at[:, 2 * Dp:2 * Dp + D].set(wv.T.astype(w_dt))

    bqkv = jnp.zeros((1, 3 * Dp), dtype=jnp.float32)
    bqkv = bqkv.at[0, 0:D].set(bq.astype(jnp.float32) * scale)
    bqkv = bqkv.at[0, Dp:Dp + D].set(bk.astype(jnp.float32))
    bqkv = bqkv.at[0, 2 * Dp:2 * Dp + D].set(bv.astype(jnp.float32))
    return wqkv, bqkv


def self_attention_forward(x, wqkv, bqkv, *, block_b=None):
    """x: (B, L, D);  wqkv: (D, 3*Dp) fused pre-transposed;  bqkv: (1, 3*Dp)."""
    B, L, D = x.shape
    Dp = wqkv.shape[1] // 3
    Lp = _round_up(L, 8)                   # sublane-aligned sequence length

    vmem_cap, multi_tc = _tpu_hw_params()
    target_rows = 256 if multi_tc else 512          # bigger tiles on 1-TC chips
    bt = (block_b if block_b is not None
          else _pick_block_b(B, Lp, target_rows=target_rows,
                             keep_two_steps=multi_tc))

    x_itemsize = jnp.dtype(x.dtype).itemsize
    w_itemsize = jnp.dtype(wqkv.dtype).itemsize

    # Never request more scoped VMEM than the chip physically has (v7x: 64 MiB);
    # shrink the row tile first if the working set does not fit.
    cap = max(32 * 1024 * 1024, vmem_cap - 8 * 1024 * 1024)
    while bt > 1 and int(1.4 * _estimate_vmem_bytes(bt * Lp, D, Dp,
                                                    x_itemsize, w_itemsize)) > cap:
        bt -= 1
        while bt > 1 and B % bt:
            bt -= 1
    est = int(1.4 * _estimate_vmem_bytes(bt * Lp, D, Dp, x_itemsize, w_itemsize))
    vmem_limit = None
    if est > 32 * 1024 * 1024:
        vmem_limit = min(est, cap)

    rows = bt * Lp
    grid = (B // bt,)

    # Sublane-pad the sequence dim wrapper-side; padded keys are masked in-kernel.
    if Lp != L:
        x = jnp.pad(x, ((0, 0), (0, Lp - L), (0, 0)))
    x2 = x.reshape(B * Lp, D)

    # Tiny per-row / per-col sequence-id vectors for the block-diagonal mask.
    seq_id = jnp.broadcast_to(
        jnp.arange(bt, dtype=jnp.int32).reshape(bt, 1), (bt, Lp)).reshape(rows)
    pos = jnp.broadcast_to(
        jnp.arange(Lp, dtype=jnp.int32).reshape(1, Lp), (bt, Lp)).reshape(rows)
    row_seq = seq_id.reshape(rows, 1)                          # (rows, 1)
    col_id = jnp.where(pos < L, seq_id, -1).reshape(1, rows)   # (1, rows)

    out2 = pl.pallas_call(
        _fused_attention_kernel,
        out_shape=jax.ShapeDtypeStruct((B * Lp, Dp), x.dtype),
        grid_spec=pltpu.PrefetchScalarGridSpec(
            num_scalar_prefetch=0,
            grid=grid,
            in_specs=[
                pl.BlockSpec((rows, D), lambda b: (b, 0)),      # x row tile
                # Constant index_map: fetched once, VMEM-resident across steps.
                pl.BlockSpec((D, 3 * Dp), lambda b: (0, 0)),    # fused weight
                pl.BlockSpec((1, 3 * Dp), lambda b: (0, 0)),    # fused bias
                pl.BlockSpec((rows, 1), lambda b: (0, 0)),      # row seq ids
                pl.BlockSpec((1, rows), lambda b: (0, 0)),      # col seq ids
            ],
            # Lane-dense (multiple-of-128) output block -> unmasked full vst.
            out_specs=pl.BlockSpec((rows, Dp), lambda b: (b, 0)),
        ),
        compiler_params=pltpu.CompilerParams(
            dimension_semantics=("parallel",),
            vmem_limit_bytes=vmem_limit),
    )(x2, wqkv, bqkv, row_seq, col_id)

    # Cheap wrapper-side un-padding of the sublane/lane-padded output.
    return out2.reshape(B, Lp, Dp)[:, :L, :D]


def make_self_attention_layer(wq, bq, wk, bk, wv, bv):
    """Build the forward closure with the fused weights prepared exactly once."""
    wqkv, bqkv = prepare_qkv(wq, bq, wk, bk, wv, bv)

    def forward(x, *, block_b=None):
        return self_attention_forward(x, wqkv, bqkv, block_b=block_b)

    return forward


def self_attention_layer(x, wq, bq, wk, bk, wv, bv, *, block_b=None):
    """One-shot convenience wrapper (prefer make_self_attention_layer for reuse)."""
    wqkv, bqkv = prepare_qkv(wq, bq, wk, bk, wv, bv)
    return self_attention_forward(x, wqkv, bqkv, block_b=block_b)


# --------------------------------------------------------------------------- #
# Reference + test
# --------------------------------------------------------------------------- #
def _reference(x, wq, bq, wk, bk, wv, bv):
    q = x @ wq.T + bq
    k = x @ wk.T + bk
    v = x @ wv.T + bv
    s = jnp.einsum("bld,bmd->blm", q, k) / math.sqrt(k.shape[-1])
    p = jax.nn.softmax(s, axis=-1)
    return jnp.einsum("blm,bmd->bld", p, v)


if __name__ == "__main__":
    # configs.enc_in -> D
    B, L, D = 2, 8, 32

    key = jax.random.PRNGKey(0)
    kx, kwq, kbq, kwk, kbk, kwv, kbv = jax.random.split(key, 7)

    x = jax.random.normal(kx, (B, L, D), dtype=jnp.float32)

    # Deterministic nn.Linear-style init: U(-1/sqrt(D), 1/sqrt(D))
    bound = 1.0 / math.sqrt(D)
    wq = jax.random.uniform(kwq, (D, D), jnp.float32, -bound, bound)
    bq = jax.random.uniform(kbq, (D,), jnp.float32, -bound, bound)
    wk = jax.random.uniform(kwk, (D, D), jnp.float32, -bound, bound)
    bk = jax.random.uniform(kbk, (D,), jnp.float32, -bound, bound)
    wv = jax.random.uniform(kwv, (D, D), jnp.float32, -bound, bound)
    bv = jax.random.uniform(kbv, (D,), jnp.float32, -bound, bound)

    # Weights fused / pre-transposed once; only the pallas_call runs per step.
    forward = jax.jit(make_self_attention_layer(wq, bq, wk, bk, wv, bv))

    out = jax.block_until_ready(forward(x))
    ref = _reference(x, wq, bq, wk, bk, wv, bv)
    assert out.shape == (B, L, D)
    max_err = float(jnp.max(jnp.abs(out - ref)))
    # Tolerance covers the EUP approx reciprocal (~2^-12 rel) in the softmax.
    assert jnp.allclose(out, ref, atol=2e-3, rtol=2e-3), max_err

    # Second config exercising the padded-L (L % 8 != 0) masked-key path.
    B2, L2 = 4, 6
    x_b = jax.random.normal(jax.random.PRNGKey(1), (B2, L2, D), dtype=jnp.float32)
    out_b = jax.block_until_ready(forward(x_b))
    ref_b = _reference(x_b, wq, bq, wk, bk, wv, bv)
    assert out_b.shape == (B2, L2, D)
    max_err_b = float(jnp.max(jnp.abs(out_b - ref_b)))
    assert jnp.allclose(out_b, ref_b, atol=2e-3, rtol=2e-3), max_err_b

    print("KERNEL_OK")
</pallas_src>

<mosaic_0001>
module attributes {stable_mosaic.version = 11 : i64} {
  func.func @_fused_attention_kernel(%arg0: i32, %arg1: memref<16x32xf32, #tpu.memory_space<vmem>>, %arg2: memref<32x384xf32, #tpu.memory_space<vmem>>, %arg3: memref<1x384xf32, #tpu.memory_space<vmem>>, %arg4: memref<16x1xi32, #tpu.memory_space<vmem>>, %arg5: memref<1x16xi32, #tpu.memory_space<vmem>>, %arg6: memref<16x128xf32, #tpu.memory_space<vmem>>) attributes {dimension_semantics = [#tpu.dimension_semantics<parallel>], iteration_bounds = array<i64: 1>, scalar_prefetch = 0 : i64, scratch_operands = 0 : i64, tpu.core_type = #tpu.core_type<tc>, window_params = [{transform_indices = @transform_0, window_bounds = array<i64: 16, 32>}, {pipeline_mode = #tpu.pipeline_mode<synchronous>, transform_indices = @transform_1, window_bounds = array<i64: 32, 384>}, {pipeline_mode = #tpu.pipeline_mode<synchronous>, transform_indices = @transform_2, window_bounds = array<i64: 1, 384>}, {pipeline_mode = #tpu.pipeline_mode<synchronous>, transform_indices = @transform_3, window_bounds = array<i64: 16, 1>}, {pipeline_mode = #tpu.pipeline_mode<synchronous>, transform_indices = @transform_4, window_bounds = array<i64: 1, 16>}, {transform_indices = @transform_5, window_bounds = array<i64: 16, 128>}]} {
    %c0 = arith.constant 0 : index
    %c0_0 = arith.constant 0 : index
    %0 = vector.load %arg1[%c0, %c0_0] : memref<16x32xf32, #tpu.memory_space<vmem>>, vector<16x32xf32>
    %c0_1 = arith.constant 0 : index
    %c0_2 = arith.constant 0 : index
    %1 = vector.load %arg2[%c0_1, %c0_2] : memref<32x384xf32, #tpu.memory_space<vmem>>, vector<32x384xf32>
    %cst = arith.constant dense<0.000000e+00> : vector<16x384xf32>
    %2 = tpu.matmul %0, %1, %cst {dimension_numbers = #tpu.dot_dimension_numbers<[1], [0], [0], [1], [0, 0, 1, 1], [], []>} : vector<16x32xf32>, vector<32x384xf32>, vector<16x384xf32> -> vector<16x384xf32>
    %c0_3 = arith.constant 0 : index
    %c0_4 = arith.constant 0 : index
    %3 = vector.load %arg3[%c0_3, %c0_4] : memref<1x384xf32, #tpu.memory_space<vmem>>, vector<1x384xf32>
    %4 = vector.broadcast %3 : vector<1x384xf32> to vector<16x384xf32>
    %5 = arith.addf %2, %4 : vector<16x384xf32>
    %6 = vector.extract_strided_slice %5 {offsets = [0, 0], sizes = [16, 128], strides = [1, 1]} : vector<16x384xf32> to vector<16x128xf32>
    %7 = vector.extract_strided_slice %5 {offsets = [0, 128], sizes = [16, 128], strides = [1, 1]} : vector<16x384xf32> to vector<16x128xf32>
    %8 = vector.extract_strided_slice %5 {offsets = [0, 256], sizes = [16, 128], strides = [1, 1]} : vector<16x384xf32> to vector<16x128xf32>
    "tpu.trace_start"() <{level = 10 : i32, message = "ld,md->lm"}> : () -> ()
    %cst_5 = arith.constant dense<0.000000e+00> : vector<16x16xf32>
    %9 = tpu.matmul %6, %7, %cst_5 {dimension_numbers = #tpu.dot_dimension_numbers<[1], [1], [0], [0], [0, 0, 1, 0], [], []>} : vector<16x128xf32>, vector<16x128xf32>, vector<16x16xf32> -> vector<16x16xf32>
    "tpu.trace_stop"() : () -> ()
    %c0_6 = arith.constant 0 : index
    %c0_7 = arith.constant 0 : index
    %10 = vector.load %arg4[%c0_6, %c0_7] : memref<16x1xi32, #tpu.memory_space<vmem>>, vector<16x1xi32>
    %c0_8 = arith.constant 0 : index
    %c0_9 = arith.constant 0 : index
    %11 = vector.load %arg5[%c0_8, %c0_9] : memref<1x16xi32, #tpu.memory_space<vmem>>, vector<1x16xi32>
    %12 = vector.broadcast %10 : vector<16x1xi32> to vector<16x16xi32>
    %13 = vector.broadcast %11 : vector<1x16xi32> to vector<16x16xi32>
    %14 = arith.cmpi eq, %12, %13 : vector<16x16xi32>
    %cst_10 = arith.constant -1.000000e+30 : f32
    %15 = vector.broadcast %cst_10 : f32 to vector<16x16xf32>
    %16 = arith.select %14, %9, %15 : vector<16x16xi1>, vector<16x16xf32>
    %cst_11 = arith.constant dense<0xFF800000> : vector<16xf32>
    %17 = vector.multi_reduction <maximumf>, %16, %cst_11 [1] : vector<16x16xf32> to vector<16xf32>
    %18 = vector.shape_cast %17 : vector<16xf32> to vector<16x1xf32>
    %19 = vector.broadcast %18 : vector<16x1xf32> to vector<16x16xf32>
    %20 = arith.subf %16, %19 : vector<16x16xf32>
    %21 = math.exp %20 : vector<16x16xf32>
    %cst_12 = arith.constant dense<0.000000e+00> : vector<16xf32>
    %22 = vector.multi_reduction <add>, %21, %cst_12 [1] : vector<16x16xf32> to vector<16xf32>
    %23 = vector.shape_cast %22 : vector<16xf32> to vector<16x1xf32>
    %24 = tpu.reciprocal %23 {approx = true} : vector<16x1xf32> -> vector<16x1xf32>
    %25 = vector.broadcast %24 : vector<16x1xf32> to vector<16x16xf32>
    %26 = arith.mulf %21, %25 : vector<16x16xf32>
    %cst_13 = arith.constant dense<0.000000e+00> : vector<16x128xf32>
    %27 = tpu.matmul %26, %8, %cst_13 {dimension_numbers = #tpu.dot_dimension_numbers<[1], [0], [0], [1], [0, 0, 1, 1], [], []>} : vector<16x16xf32>, vector<16x128xf32>, vector<16x128xf32> -> vector<16x128xf32>
    %c0_14 = arith.constant 0 : index
    %c0_15 = arith.constant 0 : index
    %28 = vector.load %arg6[%c0_14, %c0_15] : memref<16x128xf32, #tpu.memory_space<vmem>>, vector<16x128xf32>
    tpu.vector_store %arg6[%c0_14, %c0_15], %27 {strides = array<i32>} : memref<16x128xf32, #tpu.memory_space<vmem>>, vector<16x128xf32>,
    return
  }
  func.func @transform_0(%arg0: i32) -> (i32, i32) {
    %c0_i32 = arith.constant 0 : i32
    %c0_i32_0 = arith.constant 0 : i32
    return %arg0, %c0_i32 : i32, i32
  }
  func.func @transform_1(%arg0: i32) -> (i32, i32) {
    %c0_i32 = arith.constant 0 : i32
    %c0_i32_0 = arith.constant 0 : i32
    %c0_i32_1 = arith.constant 0 : i32
    return %c0_i32, %c0_i32_0 : i32, i32
  }
  func.func @transform_2(%arg0: i32) -> (i32, i32) {
    %c0_i32 = arith.constant 0 : i32
    %c0_i32_0 = arith.constant 0 : i32
    %c0_i32_1 = arith.constant 0 : i32
    return %c0_i32, %c0_i32_0 : i32, i32
  }
  func.func @transform_3(%arg0: i32) -> (i32, i32) {
    %c0_i32 = arith.constant 0 : i32
    %c0_i32_0 = arith.constant 0 : i32
    %c0_i32_1 = arith.constant 0 : i32
    return %c0_i32, %c0_i32_0 : i32, i32
  }
  func.func @transform_4(%arg0: i32) -> (i32, i32) {
    %c0_i32 = arith.constant 0 : i32
    %c0_i32_0 = arith.constant 0 : i32
    %c0_i32_1 = arith.constant 0 : i32
    return %c0_i32, %c0_i32_0 : i32, i32
  }
  func.func @transform_5(%arg0: i32) -> (i32, i32) {
    %c0_i32 = arith.constant 0 : i32
    %c0_i32_0 = arith.constant 0 : i32
    return %arg0, %c0_i32 : i32, i32
  }
}

</mosaic_0001>

<bundles_post_ra>
// kernel: forward.1
= control target key start
LH: loop header
LB: loop body
LE: loop exit
PB: predicated region body
PF: predicated region fallthrough
CT: control target
= control target key end

     0   :  { %10 = vsyncpa [#allocation3], 0  ;;  %s399_s0 = inlined_call_operand.vmem [shape: f32[16,32], index: 0, kind: input, shape index: {}]   ;;  %s400_s1 = inlined_call_operand.hbm [shape: f32[32,384], index: 1, kind: input, shape index: {}]   ;;  %s401_s2 = inlined_call_operand.vmem [shape: f32[1,384], index: 2, kind: input, shape index: {}]   ;;  %s402_s3 = inlined_call_operand.vmem [shape: s32[16,1], index: 3, kind: input, shape index: {}]   ;;  %s403_s4 = inlined_call_operand.vmem [shape: s32[1,16], index: 4, kind: input, shape index: {}]   ;;  %s404_s5 = inlined_call_operand.hbm [shape: f32[16,128], index: 5, kind: output, shape index: {}]  }
   0x1   :  { %11 = vsyncpa [#allocation4], 0  ;;  %s18_s20 = sshll.u32 %s400_s1, 4  ;;  %s326_s21 = smov [#allocation2]   ;;  %s19_s20 = int_to_ptr.hbm [resolvable:$true] %s18_s20 }
   0x2   :  { %s20_s22 = sshll.u32 %s326_s21, 4  ;;  %s327_s23 = smov 384   ;;  %s21_s22 = int_to_ptr.vmem [resolvable:$true] %s20_s22 }
   0x3   :  { %s328_s24 = smov 24  }
   0x4   :  { %26 = dma.hbm_to_vmem [thread:$0]  %s19_s20, 1536, %s21_s22, [#allocation3], %s327_s23, %s327_s23, %s328_s24  }
   0x5   :  { %322 = dma.done.wait [#allocation3], 1536  }
   0x6   :  { %323 = vsyncadd [#allocation3], 4294965760  ;;  %v48_v0 = vld [vmem:[#allocation2 + $0x48] sm:$0xff]  ;;  %v45_v1 = vld [vmem:[#allocation2 + $0x30] sm:$0xff]  ;;  %vm59_vm0 = vcmask 261120   ;;  %v329_v11 = vmov 0  }
   0x7   :  { %253 = vmatpush.msra.mxu1 %v48_v0  ;;  %78 = vmatpush.msra.mxu0 %v48_v0  ;;  %v42_v2 = vld [vmem:[#allocation2 + $0x18] sm:$0xff]  ;;  %v39_v3 = vld [vmem:[#allocation2] sm:$0xff]  ;;  %v38_v4 = vld [vmem:[%s399_s0 + $0x8] sm:$0xff]  ;;  %vm172_vm2 = vcmask 130048   ;;  %s232_s11 = sshll.u32 %s404_s5, 4  ;;  %s331_s12 = smov 128   ;;  %s233_s11 = int_to_ptr.hbm [resolvable:$true] %s232_s11 }
   0x8   :  { %v49_v5 = vld [vmem:[#allocation2 + $0x50] sm:$0xff]  ;;  %v37_v6 = vld [vmem:[%s399_s0] sm:$0xff]  ;;  %v46_v7 = vld [vmem:[#allocation2 + $0x38] sm:$0xff]  ;;  %264 = vset.pattern.permute.xlu0 %v329_v11  ;;  %s332_s13 = smov 8  }
   0x9   :  { %254 = vmatpush.msra.mxu1 %v45_v1  ;;  %79 = vmatpush.msra.mxu0 %v45_v1  ;;  %v43_v8 = vld [vmem:[#allocation2 + $0x20] sm:$0xff]  ;;  %v40_v9 = vld [vmem:[#allocation2 + $0x8] sm:$0xff]  ;;  %v50_v24 = vld [vmem:[#allocation2 + $0x58] sm:$0xff] }
   0xa   :  { %v158_v10 = vld [vmem:[%s402_s3] sm:$0xff]  ;;  %v159_v13 = vld [vmem:[%s402_s3 + $0x8] sm:$0xff]  ;;  %124 = vmatpush.msra.mxu2 %v50_v24  ;;  %v41_v27 = vld [vmem:[#allocation2 + $0x10] sm:$0xff] }
   0xb   :  { %255 = vmatpush.msra.mxu1 %v42_v2  ;;  %80 = vmatpush.msra.mxu0 %v42_v2  ;;  %v51_v15 = vld [vmem:[%s401_s2] sm:$0x7]  ;;  %v44_v26 = vld [vmem:[#allocation2 + $0x28] sm:$0xff] }
   0xc   :  { %162 = vperm.xlu0 %264, %v158_v10   ;;  %v54_v16 = vperm.slane %v51_v15, 1  ;;  %v53_v20 = vperm.slane %v51_v15, 0  ;;  %v47_v25 = vld [vmem:[#allocation2 + $0x40] sm:$0xff]  ;;  %v55_v41 = vperm.slane %v51_v15, 2 }
   0xd   :  { %256 = vmatpush.msra.mxu1 %v39_v3  ;;  %81 = vmatpush.msra.mxu0 %v39_v3  ;;  %v265_v28 = vld [vmem:[%s403_s4] ss:$0 sm:$0xff]  ;;  %s330_s4 = smov [#allocation5]  }
   0xe   :  { %246 = vmatmul.msk.f32.vlgmr.msra.gmra.mxu1 %vm59_vm0, %v38_v4  ;;  %245 = vmatmul.msk.f32.vlgmr.msra.gmra.mxu0 %vm59_vm0, %v37_v6  ;;  %s230_s8 = sshll.u32 %s330_s4, 4  ;;  %s231_s8 = int_to_ptr.vmem [resolvable:$true] %s230_s8 }
   0xf   :  { %101 = vmatpush.msrb.mxu1 %v49_v5  ;;  %125 = vmatpush.msra.mxu2 %v47_v25 }
  0x11   :  { %102 = vmatpush.msrb.mxu1 %v46_v7  ;;  %126 = vmatpush.msra.mxu2 %v44_v26 }
  0x13   :  { %103 = vmatpush.msrb.mxu1 %v43_v8  ;;  %127 = vmatpush.msra.mxu2 %v41_v27 }
  0x14   :  { %165 = vperm.xlu0 %264, %v159_v13   ;;  %249 = vmatmul.msk.f32.vlgmr.msra.gmra.mxu2 %vm59_vm0, %v37_v6 }
  0x15   :  { %104 = vmatpush.msrb.mxu1 %v40_v9 }
  0x16   :  { %247 = vmatmul.msk.f32.vlgmr.msrb.gmra.mxu1 %vm59_vm0, %v37_v6 }
  0x1c   :  { %250 = vmatmul.msk.f32.gmra.mxu2 %vm59_vm0, %v38_v4 }
  0x1e   :  { %248 = vmatmul.msk.f32.gmra.mxu1 %vm59_vm0, %v38_v4 }
  0x7e   :  { %v163_v29 = vpop.permute.xlu0 %162 }
  0x7f   :  { %vm168_vm1 = vcmp.eq.s32.totalorder %v163_v29, %v265_v28 }
  0x86   :  { %v166_v33 = vpop.permute.xlu0 %165 }
  0x87   :  { %vm169_vm3 = vcmp.eq.s32.totalorder %v166_v33, %v265_v28 }
  0x8b   :  { %v86_v12 = vpop.f32.mrf.mxu1  ;;  %v83_v19 = vpop.f32.mrf.mxu0 }
  0x8c   :  { %v84_v22 = vadd.f32 %v83_v19, %v53_v20  ;;  %v87_v23 = vadd.f32 %v86_v12, %v53_v20 }
  0x93   :  { %v106_v14 = vpop.f32.mrf.mxu1 }
  0x94   :  { %v107_v21 = vadd.f32 %v106_v14, %v54_v16 }
  0x97   :  { %v129_v38 = vpop.f32.mrf.mxu2 }
  0x98   :  { %v130_v45 = vadd.f32 %v129_v38, %v55_v41 }
  0x9b   :  { %v109_v17 = vpop.f32.mrf.mxu1 }
  0x9c   :  { %v110_v18 = vadd.f32 %v109_v17, %v54_v16 }
  0x9e   :  { %149 = vmatpush.xpose.msra.mxu3 %v110_v18 }
  0x9f   :  { %v132_v43 = vpop.f32.mrf.mxu2 }
  0xa0   :  { %v133_v46 = vadd.f32 %v132_v43, %v55_v41 }
  0xa2   :  { %150 = vmatpush.xpose.msra.mxu3 %v107_v21  ;;  %215 = vmatpush.msrb.mxu0 %v133_v46 }
  0xa4   :  { %216 = vmatpush.msrb.mxu0 %v130_v45 }
  0xa5   :  { %151 = vmatmul.f32.vlgmr.msra.gmra.mxu3 %v84_v22 }
  0xad   :  { %154 = vmatmul.f32.gmra.mxu3 %v87_v23 }
 0x128   :  { %v152_v30 = vpop.f32.mrf.mxu3 }
 0x129   :  { %v170_v31 = vsel %vm168_vm1, %v152_v30, -1e+30 }
 0x12a   :  { %v173_v32 = vsel %vm172_vm2, %v170_v31, -inf }
 0x12b   :  { %174 = vmax.xlane.f32.xlu1 %v173_v32 }
 0x130   :  { %v155_v34 = vpop.f32.mrf.mxu3 }
 0x131   :  { %v171_v35 = vsel %vm169_vm3, %v155_v34, -1e+30 }
 0x132   :  { %v176_v36 = vsel %vm172_vm2, %v171_v35, -inf }
 0x133   :  { %177 = vmax.xlane.f32.xlu1 %v176_v36 }
 0x19e   :  { %v175_v37 = vpop.xlane.xlu1 %174 }
 0x19f   :  { %v179_v39 = vsub.f32 %v170_v31, %v175_v37 }
 0x1a1   :  { %v181_v40 = vmul.f32 1.442695, %v179_v39 }
 0x1a3   :  { %266 = vpow2.f32 %v181_v40 }
 0x1a6   :  { %v178_v42 = vpop.xlane.xlu1 %177 }
 0x1a7   :  { %v180_v44 = vsub.f32 %v171_v35, %v178_v42 }
 0x1a9   :  { %v267_v47 = vpop.eup %266  ;;  %v183_v48 = vmul.f32 1.442695, %v180_v44 }
 0x1aa   :  { %v185_v49 = vsel %vm172_vm2, %v267_v47, 0.0 }
 0x1ab   :  { %268 = vpow2.f32 %v183_v48  ;;  %186 = vadd.xlane.f32.xlu2 %v185_v49 }
 0x1b1   :  { %v269_v50 = vpop.eup %268 }
 0x1b2   :  { %v188_v51 = vsel %vm172_vm2, %v269_v50, 0.0 }
 0x1b3   :  { %189 = vadd.xlane.f32.xlu2 %v188_v51 }
 0x21e   :  { %v187_v52 = vpop.xlane.xlu2 %186 }
 0x21f   :  { %270 = vrcp.f32 %v187_v52 }
 0x225   :  { %v271_v53 = vpop.eup %270 }
 0x226   :  { %v190_v54 = vpop.xlane.xlu2 %189  ;;  %v193_v55 = vmul.f32 %v271_v53, %v267_v47 }
 0x227   :  { %272 = vrcp.f32 %v190_v54 }
 0x228   :  { %251 = vmatmul.msk.f32.vlgmr.msrb.gmra.mxu0 %vm172_vm2, %v193_v55 }
 0x22d   :  { %v273_v56 = vpop.eup %272 }
 0x22e   :  { %v194_v57 = vmul.f32 %v273_v56, %v269_v50 }
 0x230   :  { %252 = vmatmul.msk.f32.gmra.mxu0 %vm172_vm2, %v194_v57 }
 0x2a5   :  { %v218_v58 = vpop.f32.mrf.mxu0 }
 0x2a6   :  { %224 = vst [vmem:[#allocation5] sm:$0xff] %v218_v58 }
 0x2ad   :  { %v221_v59 = vpop.f32.mrf.mxu0 }
 0x2ae   :  { %225 = vst [vmem:[#allocation5 + $0x8] sm:$0xff] %v221_v59 }
 0x2af   :  { %238 = dma.vmem_to_hbm [thread:$0]  %s231_s8, 256, %s233_s11, [#allocation4], %s331_s12, %s331_s12, %s332_s13  }
 0x2b0   :  { %324 = dma.done.wait [#allocation4], 256  }
 0x2b1   :  { %325 = vsyncadd [#allocation4], 4294967040 }
 0x2b2   :  { %243 = vsyncpa [#allocation3], 1 }
 0x2b3   :  { %244 = vsyncpa [#allocation4], 1 }

</bundles_post_ra>
